<compile_context>
chip_gen: v7x
topology: tpu7x:2x2x1
jax: 0.10.0
libtpu: 0.0.40
codegen_flags: <defaults>
</compile_context>

<pallas_src>
import functools

import jax
import jax.numpy as jnp
from jax.experimental import pallas as pl
from jax.experimental.pallas import tpu as pltpu


def _round_up(x, m):
    return ((x + m - 1) // m) * m


def _segment_matrix(D, global_size, part_size):
    """(D, 4) indicator: column j of the features belongs to segment seg(j)."""
    col = jnp.arange(D)
    seg_id = jnp.where(col < global_size, 0,
             jnp.where(col < global_size + part_size, 1,
             jnp.where(col < global_size + 2 * part_size, 2, 3)))
    return (seg_id[:, None] == jnp.arange(4)[None, :]).astype(jnp.float32)


def _triplet_cpdm_kernel(a_ref, p_ref, n_ref, ar_ref, pr_ref, nr_ref, seg_ref,
                         loss_ref, acc_ref, *, margin, batch_size, tile_rows,
                         needs_mask):
    i = pl.program_id(0)

    @pl.when(i == 0)
    def _init():
        acc_ref[0, 0] = 0.0

    a = a_ref[...].astype(jnp.float32)
    p = p_ref[...].astype(jnp.float32)
    n = n_ref[...].astype(jnp.float32)
    seg = seg_ref[...]                                    # (D, 4)

    # Squared differences on the VPU, then one MXU matmul per branch folds the
    # D-wide feature axis down to the 4 per-segment sums -> (TB, 4).
    dp = a - p
    dn = a - n
    seg_pos = jnp.dot(dp * dp, seg, preferred_element_type=jnp.float32)
    seg_neg = jnp.dot(dn * dn, seg, preferred_element_type=jnp.float32)

    ar = ar_ref[...].astype(jnp.float32)
    pr = pr_ref[...].astype(jnp.float32)
    nr = nr_ref[...].astype(jnp.float32)

    def normalized_cam(r1, r2):
        cam = r1 * r2                                     # (TB, 4)
        return cam / jnp.sum(cam, axis=1, keepdims=True)

    ncam_p = normalized_cam(ar, pr)
    ncam_n = normalized_cam(ar, nr)

    # dist_pos - dist_neg, fused over the 4 segments.
    diff = jnp.sum(seg_pos * ncam_p - seg_neg * ncam_n, axis=1, keepdims=True)
    losses = jnp.maximum(diff + margin, 0.0)              # (TB, 1)

    if needs_mask:
        # Only the last block can contain padding rows; `where` (a select)
        # neutralizes any garbage/NaN coming from the padded region.
        row = i * tile_rows + jax.lax.broadcasted_iota(jnp.int32, (tile_rows, 1), 0)
        losses = jnp.where(row < batch_size, losses, 0.0)

    acc_ref[0, 0] += jnp.sum(losses)

    @pl.when(i == pl.num_programs(0) - 1)
    def _finalize():
        loss_ref[0, 0] = acc_ref[0, 0] * (1.0 / batch_size)


def triplet_loss_with_cpdm(anchor, anchor_ratio, positive, positive_ratio,
                           negative, negative_ratio, *, margin=1.0,
                           global_feature_size=256, part_feature_size=128,
                           tile_rows=None,
                           vmem_limit_bytes=48 * 1024 * 1024):
    B, D = anchor.shape
    assert D == global_feature_size + 3 * part_feature_size

    if tile_rows is None:
        # Memory-bandwidth-bound kernel: pick the largest batch tile whose
        # double-buffered feature inputs (3 tensors x 2 buffers) stay under a
        # ~20 MiB budget (leaves headroom for f32 temporaries on v5e/v6e/v7x
        # with the raised scoped-VMEM limit).  Always a multiple of 8.
        input_budget = 20 * 1024 * 1024
        bytes_per_row = 3 * 2 * D * jnp.dtype(anchor.dtype).itemsize
        tb = max(8, (input_budget // bytes_per_row) // 8 * 8)
        tile_rows = int(min(tb, 1024, _round_up(B, 8)))
    assert tile_rows % 8 == 0, "tile_rows must be a multiple of 8"

    num_blocks = pl.cdiv(B, tile_rows)
    needs_mask = (B % tile_rows) != 0

    seg_mat = _segment_matrix(D, global_feature_size, part_feature_size)

    kernel = functools.partial(
        _triplet_cpdm_kernel,
        margin=float(margin),
        batch_size=B,
        tile_rows=tile_rows,
        needs_mask=needs_mask,
    )

    feat_spec = pl.BlockSpec((tile_rows, D), lambda i: (i, 0))
    ratio_spec = pl.BlockSpec((tile_rows, 4), lambda i: (i, 0))
    seg_spec = pl.BlockSpec((D, 4), lambda i: (0, 0))   # same block every step

    out = pl.pallas_call(
        kernel,
        grid=(num_blocks,),
        in_specs=[feat_spec, feat_spec, feat_spec,
                  ratio_spec, ratio_spec, ratio_spec, seg_spec],
        out_specs=pl.BlockSpec(memory_space=pltpu.SMEM),
        out_shape=jax.ShapeDtypeStruct((1, 1), jnp.float32),
        scratch_shapes=[pltpu.SMEM((1, 1), jnp.float32)],
        compiler_params=pltpu.CompilerParams(
            dimension_semantics=("arbitrary",),   # serial accumulation axis
            vmem_limit_bytes=vmem_limit_bytes),
    )(anchor, positive, negative, anchor_ratio, positive_ratio,
      negative_ratio, seg_mat)
    return out[0, 0]


def _reference(anchor, ar, positive, pr, negative, nr, *, margin,
               global_feature_size, part_feature_size):
    G, P = global_feature_size, part_feature_size

    def calc(x1, r1, x2, r2):
        cam = r1 * r2
        ncam = cam / jnp.sum(cam, axis=1, keepdims=True)
        d = (x1 - x2) ** 2
        gd = d[:, :G] * ncam[:, 0:1]
        fd = d[:, G:G + P] * ncam[:, 1:2]
        rd = d[:, G + P:G + 2 * P] * ncam[:, 2:3]
        sd = d[:, G + 2 * P:] * ncam[:, 3:]
        return jnp.concatenate((gd, fd, rd, sd), axis=1).sum(1)

    dp = calc(anchor, ar, positive, pr)
    dn = calc(anchor, ar, negative, nr)
    return jnp.mean(jnp.maximum(dp - dn + margin, 0.0))


if __name__ == "__main__":
    # Small shapes consistent with the module (scaled-down feature sizes).
    # B=20 with tile_rows=8 exercises multiple grid steps AND a partial
    # (masked) last block.
    B = 20
    GLOBAL = 256
    PART = 128
    D = GLOBAL + 3 * PART  # 640
    MARGIN = 1.0

    key = jax.random.PRNGKey(0)
    k1, k2, k3, k4, k5, k6 = jax.random.split(key, 6)

    anchor = jax.random.normal(k1, (B, D), dtype=jnp.float32)
    positive = jax.random.normal(k2, (B, D), dtype=jnp.float32)
    negative = jax.random.normal(k3, (B, D), dtype=jnp.float32)

    # Area ratios are positive fractions (visible-area ratios per part).
    anchor_ratio = jax.random.uniform(k4, (B, 4), minval=0.1, maxval=1.0)
    positive_ratio = jax.random.uniform(k5, (B, 4), minval=0.1, maxval=1.0)
    negative_ratio = jax.random.uniform(k6, (B, 4), minval=0.1, maxval=1.0)

    # Multi-block (tiled + masked) run.
    loss = triplet_loss_with_cpdm(
        anchor, anchor_ratio, positive, positive_ratio, negative,
        negative_ratio, margin=MARGIN, global_feature_size=GLOBAL,
        part_feature_size=PART, tile_rows=8)
    loss = jax.block_until_ready(loss)

    # Auto-tiled run (single masked block for this small B).
    loss_auto = triplet_loss_with_cpdm(
        anchor, anchor_ratio, positive, positive_ratio, negative,
        negative_ratio, margin=MARGIN, global_feature_size=GLOBAL,
        part_feature_size=PART)
    loss_auto = jax.block_until_ready(loss_auto)

    ref = _reference(anchor, anchor_ratio, positive, positive_ratio,
                     negative, negative_ratio, margin=MARGIN,
                     global_feature_size=GLOBAL, part_feature_size=PART)
    ref = jax.block_until_ready(ref)

    assert jnp.allclose(loss, ref, rtol=1e-5, atol=1e-5), (loss, ref)
    assert jnp.allclose(loss_auto, ref, rtol=1e-5, atol=1e-5), (loss_auto, ref)
    print("KERNEL_OK")
</pallas_src>

<mosaic_0001>
module attributes {stable_mosaic.version = 11 : i64} {
  func.func @_triplet_cpdm_kernel(%arg0: i32, %arg1: memref<8x640xf32, #tpu.memory_space<vmem>>, %arg2: memref<8x640xf32, #tpu.memory_space<vmem>>, %arg3: memref<8x640xf32, #tpu.memory_space<vmem>>, %arg4: memref<8x4xf32, #tpu.memory_space<vmem>>, %arg5: memref<8x4xf32, #tpu.memory_space<vmem>>, %arg6: memref<8x4xf32, #tpu.memory_space<vmem>>, %arg7: memref<640x4xf32, #tpu.memory_space<vmem>>, %arg8: memref<1x1xf32, #tpu.memory_space<smem>>, %arg9: memref<1x1xf32, #tpu.memory_space<smem>>) attributes {dimension_semantics = [#tpu.dimension_semantics<arbitrary>], iteration_bounds = array<i64: 3>, scalar_prefetch = 0 : i64, scratch_operands = 1 : i64, tpu.core_type = #tpu.core_type<tc>, window_params = [{transform_indices = @transform_0, window_bounds = array<i64: 8, 640>}, {transform_indices = @transform_1, window_bounds = array<i64: 8, 640>}, {transform_indices = @transform_2, window_bounds = array<i64: 8, 640>}, {transform_indices = @transform_3, window_bounds = array<i64: 8, 4>}, {transform_indices = @transform_4, window_bounds = array<i64: 8, 4>}, {transform_indices = @transform_5, window_bounds = array<i64: 8, 4>}, {pipeline_mode = #tpu.pipeline_mode<synchronous>, transform_indices = @transform_6, window_bounds = array<i64: 640, 4>}, {transform_indices = @transform_7, window_bounds = array<i64: 1, 1>}]} {
    %c0_i32 = arith.constant 0 : i32
    %0 = arith.cmpi eq, %arg0, %c0_i32 : i32
    %1 = arith.extui %0 : i1 to i32
    %c0_i32_0 = arith.constant 0 : i32
    %2 = arith.cmpi ne, %1, %c0_i32_0 : i32
    scf.if %2 {
      %cst_27 = arith.constant 0.000000e+00 : f32
      %c0_28 = arith.constant 0 : index
      %c0_29 = arith.constant 0 : index
      %53 = memref.load %arg9[%c0_28, %c0_29] : memref<1x1xf32, #tpu.memory_space<smem>>
      memref.store %cst_27, %arg9[%c0_28, %c0_29] : memref<1x1xf32, #tpu.memory_space<smem>>
    } else {
    }
    %c0 = arith.constant 0 : index
    %c0_1 = arith.constant 0 : index
    %3 = vector.load %arg1[%c0, %c0_1] : memref<8x640xf32, #tpu.memory_space<vmem>>, vector<8x640xf32>
    %c0_2 = arith.constant 0 : index
    %c0_3 = arith.constant 0 : index
    %4 = vector.load %arg2[%c0_2, %c0_3] : memref<8x640xf32, #tpu.memory_space<vmem>>, vector<8x640xf32>
    %c0_4 = arith.constant 0 : index
    %c0_5 = arith.constant 0 : index
    %5 = vector.load %arg3[%c0_4, %c0_5] : memref<8x640xf32, #tpu.memory_space<vmem>>, vector<8x640xf32>
    %c0_6 = arith.constant 0 : index
    %c0_7 = arith.constant 0 : index
    %6 = vector.load %arg7[%c0_6, %c0_7] : memref<640x4xf32, #tpu.memory_space<vmem>>, vector<640x4xf32>
    %7 = arith.subf %3, %4 : vector<8x640xf32>
    %8 = arith.subf %3, %5 : vector<8x640xf32>
    %9 = arith.mulf %7, %7 : vector<8x640xf32>
    %cst = arith.constant dense<0.000000e+00> : vector<8x4xf32>
    %10 = tpu.matmul %9, %6, %cst {dimension_numbers = #tpu.dot_dimension_numbers<[1], [0], [0], [1], [0, 0, 1, 1], [], []>} : vector<8x640xf32>, vector<640x4xf32>, vector<8x4xf32> -> vector<8x4xf32>
    %11 = arith.mulf %8, %8 : vector<8x640xf32>
    %cst_8 = arith.constant dense<0.000000e+00> : vector<8x4xf32>
    %12 = tpu.matmul %11, %6, %cst_8 {dimension_numbers = #tpu.dot_dimension_numbers<[1], [0], [0], [1], [0, 0, 1, 1], [], []>} : vector<8x640xf32>, vector<640x4xf32>, vector<8x4xf32> -> vector<8x4xf32>
    %c0_9 = arith.constant 0 : index
    %c0_10 = arith.constant 0 : index
    %13 = vector.load %arg4[%c0_9, %c0_10] : memref<8x4xf32, #tpu.memory_space<vmem>>, vector<8x4xf32>
    %c0_11 = arith.constant 0 : index
    %c0_12 = arith.constant 0 : index
    %14 = vector.load %arg5[%c0_11, %c0_12] : memref<8x4xf32, #tpu.memory_space<vmem>>, vector<8x4xf32>
    %c0_13 = arith.constant 0 : index
    %c0_14 = arith.constant 0 : index
    %15 = vector.load %arg6[%c0_13, %c0_14] : memref<8x4xf32, #tpu.memory_space<vmem>>, vector<8x4xf32>
    %16 = arith.mulf %13, %14 : vector<8x4xf32>
    %cst_15 = arith.constant dense<0.000000e+00> : vector<8xf32>
    %17 = vector.multi_reduction <add>, %16, %cst_15 [1] : vector<8x4xf32> to vector<8xf32>
    %18 = vector.shape_cast %17 : vector<8xf32> to vector<8x1xf32>
    %19 = vector.broadcast %18 : vector<8x1xf32> to vector<8x4xf32>
    %20 = arith.divf %16, %19 : vector<8x4xf32>
    %21 = arith.mulf %13, %15 : vector<8x4xf32>
    %cst_16 = arith.constant dense<0.000000e+00> : vector<8xf32>
    %22 = vector.multi_reduction <add>, %21, %cst_16 [1] : vector<8x4xf32> to vector<8xf32>
    %23 = vector.shape_cast %22 : vector<8xf32> to vector<8x1xf32>
    %24 = vector.broadcast %23 : vector<8x1xf32> to vector<8x4xf32>
    %25 = arith.divf %21, %24 : vector<8x4xf32>
    %26 = arith.mulf %10, %20 : vector<8x4xf32>
    %27 = arith.mulf %12, %25 : vector<8x4xf32>
    %28 = arith.subf %26, %27 : vector<8x4xf32>
    %cst_17 = arith.constant dense<0.000000e+00> : vector<8xf32>
    %29 = vector.multi_reduction <add>, %28, %cst_17 [1] : vector<8x4xf32> to vector<8xf32>
    %30 = vector.shape_cast %29 : vector<8xf32> to vector<8x1xf32>
    %cst_18 = arith.constant 1.000000e+00 : f32
    %31 = vector.broadcast %cst_18 : f32 to vector<8x1xf32>
    %32 = arith.addf %30, %31 : vector<8x1xf32>
    %cst_19 = arith.constant 0.000000e+00 : f32
    %33 = vector.broadcast %cst_19 : f32 to vector<8x1xf32>
    %34 = arith.maximumf %32, %33 : vector<8x1xf32>
    %c8_i32 = arith.constant 8 : i32
    %35 = arith.muli %arg0, %c8_i32 : i32
    %36 = tpu.iota {dimensions = array<i32: 0>} : vector<8x1xi32>
    %37 = vector.broadcast %35 : i32 to vector<8x1xi32>
    %38 = arith.addi %37, %36 : vector<8x1xi32>
    %c20_i32 = arith.constant 20 : i32
    %39 = vector.broadcast %c20_i32 : i32 to vector<8x1xi32>
    %40 = arith.cmpi slt, %38, %39 : vector<8x1xi32>
    %cst_20 = arith.constant 0.000000e+00 : f32
    %41 = vector.broadcast %cst_20 : f32 to vector<8x1xf32>
    %42 = arith.select %40, %34, %41 : vector<8x1xi1>, vector<8x1xf32>
    %c0_21 = arith.constant 0 : index
    %c0_22 = arith.constant 0 : index
    %43 = memref.load %arg9[%c0_21, %c0_22] : memref<1x1xf32, #tpu.memory_space<smem>>
    %44 = vector.shape_cast %42 : vector<8x1xf32> to vector<1x8x1xf32>
    %cst_23 = arith.constant dense<0.000000e+00> : vector<1xf32>
    %45 = vector.multi_reduction <add>, %44, %cst_23 [1, 2] : vector<1x8x1xf32> to vector<1xf32>
    %46 = vector.shape_cast %45 : vector<1xf32> to vector<1x1x1xf32>
    %47 = vector.extract %46[0, 0, 0] : f32 from vector<1x1x1xf32>
    %48 = arith.addf %43, %47 : f32
    %c0_24 = arith.constant 0 : index
    %c0_25 = arith.constant 0 : index
    %49 = memref.load %arg9[%c0_24, %c0_25] : memref<1x1xf32, #tpu.memory_space<smem>>
    memref.store %48, %arg9[%c0_24, %c0_25] : memref<1x1xf32, #tpu.memory_space<smem>>
    %c2_i32 = arith.constant 2 : i32
    %50 = arith.cmpi eq, %arg0, %c2_i32 : i32
    %51 = arith.extui %50 : i1 to i32
    %c0_i32_26 = arith.constant 0 : i32
    %52 = arith.cmpi ne, %51, %c0_i32_26 : i32
    scf.if %52 {
      %c0_27 = arith.constant 0 : index
      %c0_28 = arith.constant 0 : index
      %53 = memref.load %arg9[%c0_27, %c0_28] : memref<1x1xf32, #tpu.memory_space<smem>>
      %cst_29 = arith.constant 5.000000e-02 : f32
      %54 = arith.mulf %53, %cst_29 : f32
      %c0_30 = arith.constant 0 : index
      %c0_31 = arith.constant 0 : index
      %55 = memref.load %arg8[%c0_30, %c0_31] : memref<1x1xf32, #tpu.memory_space<smem>>
      memref.store %54, %arg8[%c0_30, %c0_31] : memref<1x1xf32, #tpu.memory_space<smem>>
    } else {
    }
    return
  }
  func.func @transform_0(%arg0: i32) -> (i32, i32) {
    %c0_i32 = arith.constant 0 : i32
    %c0_i32_0 = arith.constant 0 : i32
    return %arg0, %c0_i32 : i32, i32
  }
  func.func @transform_1(%arg0: i32) -> (i32, i32) {
    %c0_i32 = arith.constant 0 : i32
    %c0_i32_0 = arith.constant 0 : i32
    return %arg0, %c0_i32 : i32, i32
  }
  func.func @transform_2(%arg0: i32) -> (i32, i32) {
    %c0_i32 = arith.constant 0 : i32
    %c0_i32_0 = arith.constant 0 : i32
    return %arg0, %c0_i32 : i32, i32
  }
  func.func @transform_3(%arg0: i32) -> (i32, i32) {
    %c0_i32 = arith.constant 0 : i32
    %c0_i32_0 = arith.constant 0 : i32
    return %arg0, %c0_i32 : i32, i32
  }
  func.func @transform_4(%arg0: i32) -> (i32, i32) {
    %c0_i32 = arith.constant 0 : i32
    %c0_i32_0 = arith.constant 0 : i32
    return %arg0, %c0_i32 : i32, i32
  }
  func.func @transform_5(%arg0: i32) -> (i32, i32) {
    %c0_i32 = arith.constant 0 : i32
    %c0_i32_0 = arith.constant 0 : i32
    return %arg0, %c0_i32 : i32, i32
  }
  func.func @transform_6(%arg0: i32) -> (i32, i32) {
    %c0_i32 = arith.constant 0 : i32
    %c0_i32_0 = arith.constant 0 : i32
    %c0_i32_1 = arith.constant 0 : i32
    return %c0_i32, %c0_i32_0 : i32, i32
  }
  func.func @transform_7(%arg0: i32) -> (i32, i32) {
    %c0_i32 = arith.constant 0 : i32
    %c0_i32_0 = arith.constant 0 : i32
    %c0_i32_1 = arith.constant 0 : i32
    return %c0_i32, %c0_i32_0 : i32, i32
  }
}

</mosaic_0001>

<bundles_post_ra>
// kernel: tpu_custom_call.1
= control target key start
LH: loop header
LB: loop body
LE: loop exit
PB: predicated region body
PF: predicated region fallthrough
CT: control target
= control target key end

     0   :  { %12 = vsyncpa [#allocation4], 0  ;;  %s1594_s24 = smov 0   ;;  %s2116_s0 = inlined_call_operand.vmem [shape: f32[20,640], index: 0, kind: input, shape index: {}]   ;;  %s2117_s1 = inlined_call_operand.vmem [shape: f32[20,640], index: 1, kind: input, shape index: {}]   ;;  %s2118_s2 = inlined_call_operand.vmem [shape: f32[20,640], index: 2, kind: input, shape index: {}]   ;;  %s2119_s3 = inlined_call_operand.vmem [shape: f32[20,4], index: 3, kind: input, shape index: {}]   ;;  %s2120_s4 = inlined_call_operand.vmem [shape: f32[20,4], index: 4, kind: input, shape index: {}]   ;;  %s2121_s5 = inlined_call_operand.vmem [shape: f32[20,4], index: 5, kind: input, shape index: {}]   ;;  %s2122_s6 = inlined_call_operand.vmem [shape: f32[640,4], index: 6, kind: input, shape index: {}]   ;;  %s2123_s7 = inlined_call_operand.hbm [shape: f32[1,1], index: 7, kind: output, shape index: {}]  }
   0x1 LB: > { %s1600_s25 = sadd.s32 4294967295, %s1547_s24   ;;  %p1059_p0 = scmp.ge.s32.totalorder %s1547_s24, 1  ;;  %s1547_s24 = sphi %s1594_s24, %s18_s24  }
   0x2   : > { %p280_p1 = scmp.lt.s32.totalorder %s1547_s24, 4 }
   0x4   : > { %p281_p2 = pnand %p1059_p0, %p280_p1 }
   0x5   : > { %v393_v0 = vld [vmem:[%s2122_s6 + $0x80] sm:$0xff] (!%p281_p2)  ;;  %v394_v1 = vld [vmem:[%s2122_s6 + $0x88] sm:$0xff] (!%p281_p2)  ;;  %v395_v11 = vld [vmem:[%s2122_s6 + $0x90] sm:$0xff] (!%p281_p2)  ;;  %p329_p3 = scmp.lt.s32.totalorder (!%p281_p2), %s1600_s25, 2  ;;  %vm901_vm0 = vcmask (!%p281_p2), 31744   ;;  %vm1550_vm1 = vmmov (!%p281_p2), 0  }
   0x6   : > { %284 = sbr.rel (%p281_p2) target bundleno = 692 (0x2b4), region = 48  ;;  %v425_v2 = vld [vmem:[%s2122_s6 + $0x180] sm:$0xff] (!%p281_p2)  ;;  %v1613_v3 = vpack.c.bf16 (!%p281_p2), %v394_v1, %v393_v0  ;;  %v426_v4 = vld [vmem:[%s2122_s6 + $0x188] sm:$0xff] (!%p281_p2)  ;;  %v396_v13 = vld [vmem:[%s2122_s6 + $0x98] sm:$0xff] (!%p281_p2)  ;;  %vm929_vm3 = vcmask (!%p281_p2), 7168   ;;  %p1504_p4 = scmp.eq.s32.totalorder (!%p281_p2), %s1600_s25, 0 }
   0x7   : > { %v377_v5 = vld [vmem:[%s2122_s6] sm:$0xff] (!%p281_p2)  ;;  %v378_v6 = vld [vmem:[%s2122_s6 + $0x8] sm:$0xff] (!%p281_p2)  ;;  %v1624_v7 = vpack.c.bf16 (!%p281_p2), %v426_v4, %v425_v2  ;;  %v427_v14 = vld [vmem:[%s2122_s6 + $0x190] sm:$0xff] (!%p281_p2)  ;;  %v1651_v16 = vpack.c.bf16 (!%p281_p2), %v396_v13, %v395_v11  ;;  %p1505_p5 = scmp.eq.s32.totalorder (!%p281_p2), %s1600_s25, 2  ;;  %s1525_s15 = scalar_lea.hbm (!%p281_p2), %s2123_s7, 16 }
   0x8   : > { %v1626_v8 = vpack.c.bf16 (!%p281_p2), %v378_v6, %v377_v5  ;;  %v409_v9 = vld [vmem:[%s2122_s6 + $0x100] sm:$0xff] (!%p281_p2)  ;;  %v410_v10 = vld [vmem:[%s2122_s6 + $0x108] sm:$0xff] (!%p281_p2)  ;;  %1318 = vmatprep.subr.bf16.mxu0 (!%p281_p2), %v1613_v3  ;;  %v428_v15 = vld [vmem:[%s2122_s6 + $0x198] sm:$0xff] (!%p281_p2)  ;;  %p1526_p6 = scmp.ne.s32.totalorder (!%p281_p2), %s2123_s7, %s1525_s15  ;;  %p1531_p9 = scmp.lt.u32.totalorder (!%p281_p2), %s1525_s15, %s2123_s7 }
   0x9   : > { %v1638_v12 = vpack.c.bf16 (!%p281_p2), %v410_v10, %v409_v9  ;;  %1350 = vmatprep.subr.bf16.mxu1 (!%p281_p2), %v1624_v7  ;;  %v1653_v17 = vpack.c.bf16 (!%p281_p2), %v428_v15, %v427_v14  ;;  %v379_v18 = vld [vmem:[%s2122_s6 + $0x10] sm:$0xff] (!%p281_p2)  ;;  %v380_v19 = vld [vmem:[%s2122_s6 + $0x18] sm:$0xff] (!%p281_p2)  ;;  %v397_v23 = vld [vmem:[%s2122_s6 + $0xa0] sm:$0xff] (!%p281_p2) }
   0xa   : > { %1320 = vmatpush3.bf16.msra.mxu0 (!%p281_p2), %v1626_v8  ;;  %v411_v20 = vld [vmem:[%s2122_s6 + $0x110] sm:$0xff] (!%p281_p2)  ;;  %v1665_v21 = vpack.c.bf16 (!%p281_p2), %v380_v19, %v379_v18  ;;  %v412_v22 = vld [vmem:[%s2122_s6 + $0x118] sm:$0xff] (!%p281_p2)  ;;  %v398_v24 = vld [vmem:[%s2122_s6 + $0xa8] sm:$0xff] (!%p281_p2)  ;;  %p1527_p7 = pnand (!%p281_p2), %p1526_p6, %p1505_p5 }
   0xb   : > { %1352 = vmatpush3.bf16.msra.mxu1 (!%p281_p2), %v1638_v12  ;;  %1322 = vmatprep.subr.bf16.mxu0 (!%p281_p2), %v1651_v16  ;;  %v1678_v25 = vpack.c.bf16 (!%p281_p2), %v412_v22, %v411_v20  ;;  %v1680_v26 = vpack.c.bf16 (!%p281_p2), %v398_v24, %v397_v23  ;;  %v429_v27 = vld [vmem:[%s2122_s6 + $0x1a0] sm:$0xff] (!%p281_p2)  ;;  %v430_v28 = vld [vmem:[%s2122_s6 + $0x1a8] sm:$0xff] (!%p281_p2)  ;;  %v399_v35 = vld [vmem:[%s2122_s6 + $0xb0] sm:$0xff] (!%p281_p2) }
   0xc   : > { %1354 = vmatprep.subr.bf16.mxu1 (!%p281_p2), %v1653_v17  ;;  %v381_v29 = vld [vmem:[%s2122_s6 + $0x20] sm:$0xff] (!%p281_p2)  ;;  %v1692_v30 = vpack.c.bf16 (!%p281_p2), %v430_v28, %v429_v27  ;;  %v382_v31 = vld [vmem:[%s2122_s6 + $0x28] sm:$0xff] (!%p281_p2)  ;;  %v400_v36 = vld [vmem:[%s2122_s6 + $0xb8] sm:$0xff] (!%p281_p2)  ;;  %p1528_p8 = pneg (!%p281_p2), %p1527_p7 }
   0xd   : > { %v413_v32 = vld [vmem:[%s2122_s6 + $0x120] sm:$0xff]  ;;  %v414_v33 = vld [vmem:[%s2122_s6 + $0x128] sm:$0xff]  ;;  %v1704_v34 = vpack.c.bf16 %v382_v31, %v381_v29  ;;  %v431_v37 = vld [vmem:[%s2122_s6 + $0x1b0] sm:$0xff]  ;;  %v1719_v39 = vpack.c.bf16 %v400_v36, %v399_v35  ;;  %s1745_s29 = scalar_select %p329_p3, %s1600_s25, 2 }
   0xe   : > { %1324 = vmatpush3.bf16.msra.mxu0 %v1665_v21  ;;  %v1717_v38 = vpack.c.bf16 %v414_v33, %v413_v32  ;;  %v432_v40 = vld [vmem:[%s2122_s6 + $0x1b8] sm:$0xff]  ;;  %v383_v41 = vld [vmem:[%s2122_s6 + $0x30] sm:$0xff]  ;;  %v401_v46 = vld [vmem:[%s2122_s6 + $0xc0] sm:$0xff]  ;;  %p1533_p10 = pnand %p1531_p9, %p1528_p8 }
   0xf   : > { %1356 = vmatpush3.bf16.msra.mxu1 %v1678_v25  ;;  %1326 = vmatprep.subr.bf16.mxu0 %v1680_v26  ;;  %v384_v42 = vld [vmem:[%s2122_s6 + $0x38] sm:$0xff]  ;;  %v1731_v43 = vpack.c.bf16 %v432_v40, %v431_v37  ;;  %v415_v44 = vld [vmem:[%s2122_s6 + $0x130] sm:$0xff]  ;;  %v402_v47 = vld [vmem:[%s2122_s6 + $0xc8] sm:$0xff]  ;;  %s1787_s27 = smul.u32 40, %s1745_s29  ;;  %s1916_s19 = sshll.u32 %s1745_s29, 3 }
  0x10   : > { %1358 = vmatprep.subr.bf16.mxu1 %v1692_v30  ;;  %v416_v45 = vld [vmem:[%s2122_s6 + $0x138] sm:$0xff]  ;;  %v433_v48 = vld [vmem:[%s2122_s6 + $0x1c0] sm:$0xff]  ;;  %v434_v49 = vld [vmem:[%s2122_s6 + $0x1c8] sm:$0xff]  ;;  %v1757_v50 = vpack.c.bf16 %v384_v42, %v383_v41  ;;  %v1763_v52 = vpack.c.bf16 %v402_v47, %v401_v46  ;;  %s347_s28 = scalar_lea.vmem %s2119_s3, %s1916_s19  ;;  %s351_s14 = scalar_lea.vmem %s2120_s4, %s1916_s19 }
  0x11   : > { %v1761_v51 = vpack.c.bf16 %v416_v45, %v415_v44  ;;  %v385_v53 = vld [vmem:[%s2122_s6 + $0x40] sm:$0xff]  ;;  %v386_v54 = vld [vmem:[%s2122_s6 + $0x48] sm:$0xff]  ;;  %v1775_v56 = vpack.c.bf16 %v434_v49, %v433_v48  ;;  %v403_v58 = vld [vmem:[%s2122_s6 + $0xd0] sm:$0xff]  ;;  %s1829_s26 = scalar_lea.vmem %s2116_s0, %s1787_s27  ;;  %s1835_s8 = scalar_lea.vmem %s2117_s1, %s1787_s27 }
  0x12   : > { %1328 = vmatpush3.bf16.msra.mxu0 %v1704_v34  ;;  %v417_v55 = vld [vmem:[%s2122_s6 + $0x140] sm:$0xff]  ;;  %v418_v57 = vld [vmem:[%s2122_s6 + $0x148] sm:$0xff]  ;;  %v404_v59 = vld [vmem:[%s2122_s6 + $0xd8] sm:$0xff]  ;;  %v1796_v62 = vpack.c.bf16 %v386_v54, %v385_v53  ;;  %s1909_s18 = scalar_lea.vmem %s2118_s2, %s1787_s27  ;;  %s355_s17 = scalar_lea.vmem %s2121_s5, %s1916_s19 }
  0x13   : > { %1360 = vmatpush3.bf16.msra.mxu1 %v1717_v38  ;;  %1330 = vmatprep.subr.bf16.mxu0 %v1719_v39  ;;  %v435_v60 = vld [vmem:[%s2122_s6 + $0x1d0] sm:$0xff]  ;;  %v436_v61 = vld [vmem:[%s2122_s6 + $0x1d8] sm:$0xff]  ;;  %v1800_v63 = vpack.c.bf16 %v418_v57, %v417_v55  ;;  %v1802_v0 = vpack.c.bf16 %v404_v59, %v403_v58  ;;  %v405_v9 = vld [vmem:[%s2122_s6 + $0xe0] sm:$0xff] }
  0x14   : > { %1362 = vmatprep.subr.bf16.mxu1 %v1731_v43  ;;  %v387_v1 = vld [vmem:[%s2122_s6 + $0x50] sm:$0xff]  ;;  %v388_v2 = vld [vmem:[%s2122_s6 + $0x58] sm:$0xff]  ;;  %v1814_v5 = vpack.c.bf16 %v436_v61, %v435_v60  ;;  %v406_v10 = vld [vmem:[%s2122_s6 + $0xe8] sm:$0xff] }
  0x15   : > { %v419_v4 = vld [vmem:[%s2122_s6 + $0x150] sm:$0xff]  ;;  %v420_v6 = vld [vmem:[%s2122_s6 + $0x158] sm:$0xff]  ;;  %v437_v11 = vld [vmem:[%s2122_s6 + $0x1e0] sm:$0xff]  ;;  %v1847_v15 = vpack.c.bf16 %v388_v2, %v387_v1  ;;  %v1862_v23 = vpack.c.bf16 %v406_v10, %v405_v9 }
  0x16   : > { %1332 = vmatpush3.bf16.msra.mxu0 %v1757_v50  ;;  %v438_v13 = vld [vmem:[%s2122_s6 + $0x1e8] sm:$0xff]  ;;  %v389_v14 = vld [vmem:[%s2122_s6 + $0x60] sm:$0xff]  ;;  %v1860_v22 = vpack.c.bf16 %v420_v6, %v419_v4  ;;  %v407_v24 = vld [vmem:[%s2122_s6 + $0xf0] sm:$0xff] }
  0x17   : > { %1364 = vmatpush3.bf16.msra.mxu1 %v1761_v51  ;;  %1334 = vmatprep.subr.bf16.mxu0 %v1763_v52  ;;  %v390_v18 = vld [vmem:[%s2122_s6 + $0x68] sm:$0xff]  ;;  %v421_v19 = vld [vmem:[%s2122_s6 + $0x160] sm:$0xff]  ;;  %v1870_v29 = vpack.c.bf16 %v438_v13, %v437_v11  ;;  %v408_v31 = vld [vmem:[%s2122_s6 + $0xf8] sm:$0xff] }
  0x18   : > { %1366 = vmatprep.subr.bf16.mxu1 %v1775_v56  ;;  %v422_v20 = vld [vmem:[%s2122_s6 + $0x168] sm:$0xff]  ;;  %v1876_v33 = vld [vmem:[%s1829_s26 + $0x18] sm:$0xff]  ;;  %v439_v36 = vld [vmem:[%s2122_s6 + $0x1f0] sm:$0xff]  ;;  %v1887_v41 = vpack.c.bf16 %v390_v18, %v389_v14  ;;  %v1900_v48 = vpack.c.bf16 %v408_v31, %v407_v24 }
  0x19   : > { %v363_v27 = vld [vmem:[%s1829_s26 + $0x8] sm:$0xff]  ;;  %v370_v35 = vld [vmem:[%s1835_s8 + $0x18] sm:$0xff]  ;;  %v391_v42 = vld [vmem:[%s2122_s6 + $0x70] sm:$0xff]  ;;  %v1898_v47 = vpack.c.bf16 %v422_v20, %v421_v19  ;;  %v1549_v20 = vmov 0.0|0.0  }
  0x1a   : > { %1336 = vmatpush3.bf16.msra.mxu0 %v1796_v62  ;;  %v368_v28 = vld [vmem:[%s1835_s8 + $0x8] sm:$0xff]  ;;  %v440_v37 = vld [vmem:[%s2122_s6 + $0x1f8] sm:$0xff]  ;;  %v460_v40 = vsub.f32 %v1876_v33, %v370_v35  ;;  %v1893_v45 = vld [vmem:[%s1829_s26] sm:$0xff] }
  0x1b   : > { %1368 = vmatpush3.bf16.msra.mxu1 %v1800_v63  ;;  %1338 = vmatprep.subr.bf16.mxu0 %v1802_v0  ;;  %v458_v32 = vsub.f32 %v363_v27, %v368_v28  ;;  %v367_v46 = vld [vmem:[%s1835_s8] sm:$0xff]  ;;  %v392_v49 = vld [vmem:[%s2122_s6 + $0x78] sm:$0xff]  ;;  %v1912_v54 = vld [vmem:[%s1829_s26 + $0x10] sm:$0xff]  ;;  %v1919_v57 = vpack.c.bf16 %v440_v37, %v439_v36 }
  0x1c   : > { %1370 = vmatprep.subr.bf16.mxu1 %v1814_v5  ;;  %v470_v53 = vmul.f32 %v460_v40, %v460_v40  ;;  %v369_v55 = vld [vmem:[%s1835_s8 + $0x10] sm:$0xff]  ;;  %v424_v59 = vld [vmem:[%s2122_s6 + $0x178] sm:$0xff]  ;;  %v457_v60 = vsub.f32 %v1893_v45, %v367_v46  ;;  %v1929_v61 = vpack.c.bf16 %v392_v49, %v391_v42  ;;  %v373_v1 = vld [vmem:[%s1909_s18 + $0x8] sm:$0xff]  ;;  %v1551_v42 = vmov 0.0  }
  0x1d   : > { %v468_v44 = vmul.f32 %v458_v32, %v458_v32  ;;  %v423_v58 = vld [vmem:[%s2122_s6 + $0x170] sm:$0xff]  ;;  %v459_v2 = vsub.f32 %v1912_v54, %v369_v55  ;;  %v441_v6 = vld [vmem:[%s2122_s6 + $0x200] sm:$0xff]  ;;  %v442_v9 = vld [vmem:[%s2122_s6 + $0x208] sm:$0xff]  ;;  %v463_v10 = vsub.f32 %v363_v27, %v373_v1 }
  0x1e   : > { %1340 = vmatpush3.bf16.msra.mxu0 %v1847_v15  ;;  %606 = vmatprep.mubr.f32.mxu1 %v470_v53  ;;  %v1939_v4 = vpack.c.bf16 %v424_v59, %v423_v58  ;;  %v467_v11 = vmul.f32 %v457_v60, %v457_v60  ;;  %v897_v13 = vld [vmem:[%s347_s28] sm:$0xff]  ;;  %v1957_v18 = vpack.c.bf16 %v442_v9, %v441_v6  ;;  %v443_v24 = vld [vmem:[%s2122_s6 + $0x210] sm:$0xff]  ;;  %v444_v27 = vld [vmem:[%s2122_s6 + $0x218] sm:$0xff] }
  0x1f   : > { %1372 = vmatpush3.bf16.msra.mxu1 %v1860_v22  ;;  %1342 = vmatprep.subr.bf16.mxu0 %v1862_v23  ;;  %v469_v14 = vmul.f32 %v459_v2, %v459_v2  ;;  %v898_v19 = vld [vmem:[%s351_s14] sm:$0xff]  ;;  %v683_v32 = vmul.f32 %v463_v10, %v463_v10  ;;  %v1971_v35 = vpack.c.bf16 %v444_v27, %v443_v24  ;;  %v446_v40 = vld [vmem:[%s2122_s6 + $0x228] sm:$0xff]  ;;  %v448_v46 = vld [vmem:[%s2122_s6 + $0x238] sm:$0xff] }
  0x20   : > { %1374 = vmatprep.subr.bf16.mxu1 %v1870_v29  ;;  %536 = vmatprep.mubr.f32.mxu0 %v468_v44  ;;  %v1967_v28 = vmul.f32 %v898_v19, %v897_v13  ;;  %v899_v31 = vld [vmem:[%s355_s17] sm:$0xff]  ;;  %v450_v53 = vld [vmem:[%s2122_s6 + $0x248] sm:$0xff]  ;;  %v452_v55 = vld [vmem:[%s2122_s6 + $0x258] sm:$0xff] }
  0x21   : > { %v1975_v37 = vmul.f32 %v899_v31, %v897_v13  ;;  %v454_v58 = vld [vmem:[%s2122_s6 + $0x268] sm:$0xff]  ;;  %v371_v60 = vld [vmem:[%s1835_s8 + $0x20] sm:$0xff]  ;;  %v456_v2 = vld [vmem:[%s2122_s6 + $0x278] sm:$0xff]  ;;  %s1552_s8 = smov 0.0  }
  0x22   : > { %1344 = vmatpush3.bf16.msra.mxu0 %v1887_v41  ;;  %v902_v36 = vsel %vm901_vm0, %v1967_v28, 0.0  ;;  %v372_v1 = vld [vmem:[%s1909_s18] sm:$0xff]  ;;  %1497 = sst [smem:[#allocation2]] (%p1504_p4), %s1552_s8 }
  0x23   : > { %1376 = vmatpush3.bf16.msra.mxu1 %v1898_v47  ;;  %1346 = vmatprep.subr.bf16.mxu0 %v1900_v48  ;;  %v908_v44 = vsel %vm901_vm0, %v1975_v37, 0.0  ;;  %v462_v9 = vsub.f32 %v1893_v45, %v372_v1 }
  0x24   : > { %1378 = vmatprep.subr.bf16.mxu1 %v1919_v57  ;;  %903 = vadd.xlane.f32.xlu0 %v902_v36 }
  0x25   : > { %v682_v13 = vmul.f32 %v462_v9, %v462_v9 }
  0x26   : > { %1348 = vmatpush3.bf16.msra.mxu0 %v1929_v61 }
  0x27   : > { %1380 = vmatpush3.bf16.msra.mxu1 %v1939_v4  ;;  %1381 = vmatprep.subr.bf16.mxu0 %v1549_v20 }
  0x28   : > { %1406 = vmatprep.subr.bf16.mxu1 %v1613_v3  ;;  %v445_v3 = vld [vmem:[%s2122_s6 + $0x220] sm:$0xff]  ;;  %909 = vadd.xlane.f32.xlu0 %v908_v44  ;;  %v922_v44 = vlaneseq }
  0x29   : > { %537 = vmatmul.mubr.f32.vlgmr.msra.gmra.mrb[0].mxu0 %v467_v11 }
  0x2a   : > { %607 = vmatmul.mubr.f32.vlgmr.msra.gmra.mrb[0].mxu1 %v469_v14  ;;  %1383 = vmatpush3.bf16.msra.mxu0 %v1957_v18 }
  0x2b   : > { %1384 = vmatprep.subr.bf16.mxu0 %v1549_v20  ;;  %1408 = vmatpush3.bf16.msra.mxu1 %v1626_v8  ;;  %v1989_v8 = vpack.c.bf16 %v446_v40, %v445_v3 }
  0x2c   : > { %1410 = vmatprep.subr.bf16.mxu1 %v1651_v16  ;;  %1279 = vmatprep.mubr.msk.f32.mxu0 %vm1550_vm1, %v1551_v42  ;;  %v447_v16 = vld [vmem:[%s2122_s6 + $0x230] sm:$0xff] }
  0x2d   : > { %751 = vmatprep.mubr.f32.mxu1 %v683_v32  ;;  %v2003_v49 = vpack.c.bf16 %v448_v46, %v447_v16  ;;  %v923_v16 = vshrl.u32 %v922_v44, 7 }
  0x2e   : > { %1386 = vmatpush3.bf16.msra.mxu0 %v1971_v35 }
  0x2f   : > { %1387 = vmatprep.subr.bf16.mxu0 %v1549_v20  ;;  %1412 = vmatpush3.bf16.msra.mxu1 %v1665_v21  ;;  %v449_v21 = vld [vmem:[%s2122_s6 + $0x240] sm:$0xff] }
  0x30   : > { %1414 = vmatprep.subr.bf16.mxu1 %v1680_v26  ;;  %v1394_v26 = vpack.c.bf16 %v450_v53, %v449_v21 }
  0x32   : > { %1389 = vmatpush3.bf16.msra.mxu0 %v1989_v8 }
  0x33   : > { %1390 = vmatprep.subr.bf16.mxu0 %v1549_v20  ;;  %1416 = vmatpush3.bf16.msra.mxu1 %v1704_v34  ;;  %v451_v34 = vld [vmem:[%s2122_s6 + $0x250] sm:$0xff] }
  0x34   : > { %1418 = vmatprep.subr.bf16.mxu1 %v1719_v39  ;;  %v1397_v39 = vpack.c.bf16 %v452_v55, %v451_v34 }
  0x36   : > { %1392 = vmatpush3.bf16.msra.mxu0 %v2003_v49 }
  0x37   : > { %1393 = vmatprep.subr.bf16.mxu0 %v1549_v20  ;;  %1420 = vmatpush3.bf16.msra.mxu1 %v1757_v50  ;;  %v453_v50 = vld [vmem:[%s2122_s6 + $0x260] sm:$0xff] }
  0x38   : > { %1422 = vmatprep.subr.bf16.mxu1 %v1763_v52  ;;  %v1400_v59 = vpack.c.bf16 %v454_v58, %v453_v50  ;;  %v366_v52 = vld [vmem:[%s1829_s26 + $0x20] sm:$0xff]  ;;  %s1067_s26 = sshll.u32 %s1600_s25, 3 }
  0x39   : > { %v461_v6 = vsub.f32 %v366_v52, %v371_v60  ;;  %v924_v46 = vstv %s1067_s26 }
  0x3a   : > { %1395 = vmatpush3.bf16.msra.mxu0 %v1394_v26 }
  0x3b   : > { %1396 = vmatprep.subr.bf16.mxu0 %v1549_v20  ;;  %1424 = vmatpush3.bf16.msra.mxu1 %v1796_v62  ;;  %v455_v62 = vld [vmem:[%s2122_s6 + $0x270] sm:$0xff]  ;;  %v471_v11 = vmul.f32 %v461_v6, %v461_v6 }
  0x3c   : > { %1426 = vmatprep.subr.bf16.mxu1 %v1802_v0  ;;  %v375_v0 = vld [vmem:[%s1909_s18 + $0x18] sm:$0xff]  ;;  %v1403_v10 = vpack.c.bf16 %v456_v2, %v455_v62 }
  0x3e   : > { %1398 = vmatpush3.bf16.msra.mxu0 %v1397_v39 }
  0x3f   : > { %1399 = vmatprep.subr.bf16.mxu0 %v1549_v20  ;;  %1428 = vmatpush3.bf16.msra.mxu1 %v1847_v15  ;;  %v465_v15 = vsub.f32 %v1876_v33, %v375_v0 }
  0x40   : > { %1430 = vmatprep.subr.bf16.mxu1 %v1862_v23 }
  0x41   : > { %v685_v23 = vmul.f32 %v465_v15, %v465_v15 }
  0x42   : > { %1401 = vmatpush3.bf16.msra.mxu0 %v1400_v59 }
  0x43   : > { %1402 = vmatprep.subr.bf16.mxu0 %v1549_v20  ;;  %1432 = vmatpush3.bf16.msra.mxu1 %v1887_v41 }
  0x44   : > { %1434 = vmatprep.subr.bf16.mxu1 %v1900_v48 }
  0x46   : > { %1404 = vmatpush3.bf16.msra.mxu0 %v1403_v10 }
  0x47   : > { %1438 = vmatprep.subr.bf16.mxu0 %v1624_v7  ;;  %1436 = vmatpush3.bf16.msra.mxu1 %v1929_v61  ;;  %v374_v7 = vld [vmem:[%s1909_s18 + $0x10] sm:$0xff] }
  0x48   : > { %1469 = vmatprep.subr.bf16.mxu1 %v1549_v20 }
  0x49   : > { %1280 = vmatmul.mubr.f32.vlgmr.msra.gmra.mrb[2].mxu0 %v471_v11 }
  0x4a   : > { %1440 = vmatpush3.bf16.msra.mxu0 %v1638_v12  ;;  %752 = vmatmul.mubr.f32.vlgmr.msra.gmra.mrb[2].mxu1 %v682_v13  ;;  %v376_v12 = vld [vmem:[%s1909_s18 + $0x20] sm:$0xff]  ;;  %s928_s18 = sld [smem:[#allocation2]] }
  0x4b   : > { %1442 = vmatprep.subr.bf16.mxu0 %v1653_v17  ;;  %1471 = vmatpush3.bf16.msra.mxu1 %v1957_v18  ;;  %v464_v17 = vsub.f32 %v1912_v54, %v374_v7 }
  0x4c   : > { %1472 = vmatprep.subr.bf16.mxu1 %v1549_v20  ;;  %821 = vmatprep.mubr.f32.mxu0 %v685_v23 }
  0x4d   : > { %1314 = vmatprep.mubr.msk.f32.mxu1 %vm1550_vm1, %v1551_v42 }
  0x4e   : > { %1444 = vmatpush3.bf16.msra.mxu0 %v1678_v25  ;;  %v466_v25 = vsub.f32 %v366_v52, %v376_v12 }
  0x4f   : > { %1446 = vmatprep.subr.bf16.mxu0 %v1692_v30  ;;  %1474 = vmatpush3.bf16.msra.mxu1 %v1971_v35  ;;  %v684_v30 = vmul.f32 %v464_v17, %v464_v17 }
  0x50   : > { %1475 = vmatprep.subr.bf16.mxu1 %v1549_v20 }
  0x52   : > { %1448 = vmatpush3.bf16.msra.mxu0 %v1717_v38  ;;  %v686_v38 = vmul.f32 %v466_v25, %v466_v25 }
  0x53   : > { %1450 = vmatprep.subr.bf16.mxu0 %v1731_v43  ;;  %1477 = vmatpush3.bf16.msra.mxu1 %v1989_v8 }
  0x54   : > { %1478 = vmatprep.subr.bf16.mxu1 %v1549_v20 }
  0x56   : > { %1452 = vmatpush3.bf16.msra.mxu0 %v1761_v51 }
  0x57   : > { %1454 = vmatprep.subr.bf16.mxu0 %v1775_v56  ;;  %1480 = vmatpush3.bf16.msra.mxu1 %v2003_v49  ;;  %v925_v49 = vadd.s32 %v924_v46, %v923_v16 }
  0x58   : > { %1481 = vmatprep.subr.bf16.mxu1 %v1549_v20 }
  0x59   : > { %vm926_vm2 = vcmp.lt.s32.totalorder %v925_v49, 20 }
  0x5a   : > { %1456 = vmatpush3.bf16.msra.mxu0 %v1800_v63 }
  0x5b   : > { %1458 = vmatprep.subr.bf16.mxu0 %v1814_v5  ;;  %1483 = vmatpush3.bf16.msra.mxu1 %v1394_v26 }
  0x5c   : > { %1484 = vmatprep.subr.bf16.mxu1 %v1549_v20 }
  0x5e   : > { %1460 = vmatpush3.bf16.msra.mxu0 %v1860_v22 }
  0x5f   : > { %1462 = vmatprep.subr.bf16.mxu0 %v1870_v29  ;;  %1486 = vmatpush3.bf16.msra.mxu1 %v1397_v39 }
  0x60   : > { %1487 = vmatprep.subr.bf16.mxu1 %v1549_v20 }
  0x62   : > { %1464 = vmatpush3.bf16.msra.mxu0 %v1898_v47 }
  0x63   : > { %1466 = vmatprep.subr.bf16.mxu0 %v1919_v57  ;;  %1489 = vmatpush3.bf16.msra.mxu1 %v1400_v59 }
  0x64   : > { %1490 = vmatprep.subr.bf16.mxu1 %v1549_v20 }
  0x66   : > { %1468 = vmatpush3.bf16.msra.mxu0 %v1939_v4 }
  0x67   : > { %1492 = vmatpush3.bf16.msra.mxu1 %v1403_v10 }
  0x69   : > { %822 = vmatmul.mubr.f32.vlgmr.msra.gmra.mrb[4].mxu0 %v684_v30 }
  0x6a   : > { %1315 = vmatmul.mubr.f32.vlgmr.msra.gmra.mrb[4].mxu1 %v686_v38 }
  0xb1   : > { %v904_v57 = vpop.xlane.xlu0 %903 }
  0xb2   : > { %1521 = vrcp.f32 %v904_v57 }
  0xb5   : > { %v910_v61 = vpop.xlane.xlu0 %909 }
  0xb6   : > { %1523 = vrcp.f32 %v910_v61 }
  0xbc   : > { %v1522_v4 = vpop.eup %1521 }
  0xbd   : > { %v906_v31 = vmul.f32 %v1522_v4, %v1967_v28 }
  0xc0   : > { %v1524_v18 = vpop.eup %1523 }
  0xc1   : > { %v912_v35 = vmul.f32 %v1524_v18, %v1975_v37 }
  0xfc   : > { %v1105_v43 = vpop.f32.mrb[0].mxu0 }
  0xfd   : > { %v1140_v51 = vpop.f32.mrb[0].mxu1  ;;  %v1106_v56 = vpop.f32.mrb[1].mxu0 }
  0xfe   : > { %v1107_v63 = vadd.f32 %v1106_v56, %v1105_v43  ;;  %v1141_v5 = vpop.f32.mrb[1].mxu1 }
  0xff   : > { %v1142_v22 = vadd.f32 %v1141_v5, %v1140_v51 }
 0x101   : > { %v609_v29 = vadd.f32 %v1142_v22, %v1107_v63 }
 0x11c   : > { %v678_v33 = vpop.f32.mrb[2].mxu0 }
 0x11d   : > { %v679_v41 = vadd.f32 %v678_v33, %v609_v29  ;;  %v1281_v45 = vpop.f32.mrb[3].mxu0  ;;  %v1192_v47 = vpop.f32.mrb[2].mxu1 }
 0x11e   : > { %v1193_v48 = vpop.f32.mrb[3].mxu1 }
 0x11f   : > { %v1194_v54 = vadd.f32 %v1193_v48, %v1192_v47  ;;  %v913_v3 = vmul.f32 %v906_v31, %v679_v41 }
 0x13c   : > { %v1227_v14 = vpop.f32.mrb[4].mxu0 }
 0x13d   : > { %v1228_v19 = vpop.f32.mrb[5].mxu0  ;;  %v893_v20 = vpop.f32.mrb[4].mxu1 }
 0x13e   : > { %v1229_v24 = vadd.f32 %v1228_v19, %v1227_v14  ;;  %v1316_v27 = vpop.f32.mrb[5].mxu1 }
 0x140   : > { %v824_v32 = vadd.f32 %v1229_v24, %v1194_v54 }
 0x142   : > { %v894_v36 = vadd.f32 %v893_v20, %v824_v32 }
 0x144   : > { %v914_v40 = vmul.f32 %v912_v35, %v894_v36 }
 0x146   : > { %v915_v42 = vsub.f32 %v913_v3, %v914_v40 }
 0x148   : > { %v916_v8 = vsel %vm901_vm0, %v915_v42, 0.0 }
 0x149   : > { %917 = vadd.xlane.f32.xlu1 %v916_v8 }
 0x1d6   : > { %v918_v21 = vpop.xlane.xlu1 %917 }
 0x1d7   : > { %v919_v53 = vadd.f32 1.0, %v918_v21 }
 0x1d9   : > { %v920_v28 = vmax.f32 %v919_v53, 0.0 }
 0x1db   : > { %v927_v26 = vsel %vm926_vm2, %v920_v28, 0.0 }
 0x1dc   : > { %v930_v37 = vsel %vm929_vm3, %v927_v26, 0.0 }
 0x1dd   : > { %931 = vadd.xlane.f32.xlu1 %v930_v37 }
 0x26a   : > { %v932_v34 = vpop.xlane.xlu1 %931 }
 0x26b   : > { %v933_v55 = vrot.slane %v932_v34, 4 }
 0x26d   : > { %v934_v39 = vadd.f32 %v933_v55, %v932_v34 }
 0x26f   : > { %v935_v50 = vrot.slane %v934_v39, 2 }
 0x271   : > { %v936_v58 = vadd.f32 %v935_v50, %v934_v39 }
 0x273   : > { %v937_v59 = vrot.slane %v936_v58, 1 }
 0x275   : > { %v938_v52 = vadd.f32 %v937_v59, %v936_v58 }
 0x277   : > { %1494 = vpush %v938_v52 }
 0x2a8   : > { %s1495_s10 = spop %1494 }
 0x2a9   : > { %s940_s11 = sadd.f32 %s1495_s10, %s928_s18 }
 0x2ab   : > { %942 = sst [smem:[#allocation2]] %s940_s11  ;;  %s948_s12 = smul.f32 0.05, %s940_s11 }
 0x2ad   : > { %1499 = sst [smem:[#allocation3]] (%p1505_p5), %s948_s12 }
 0x2ae   : > { %1536 = shalt.err (!%p1533_p10)
}
 0x2af   : > { %s1553_s22 = smov [#allocation3]  }
 0x2b0   : > { %1501 = dma.smem_to_hbm (%p1505_p5), %s1553_s22, 16, %s2123_s7, [#allocation4]  }
 0x2b1   : > { %1542 = dma.done.wait (%p1505_p5), [#allocation4], 16  }
 0x2b2   : > { %1544 = vsyncadd (%p1505_p5), [#allocation4], 4294967280 }
 0x2b3   : > { %964 = sfence }
 0x2b4 PF: > { %s18_s24 = sadd.s32 1, %s1547_s24  }
 0x2b5   : > { %p15_p11 = scmp.ge.s32.totalorder %s18_s24, 5  }
 0x2b7   :  { %17 = sbr.rel (!%p15_p11) target bundleno = 1 (0x1), region = 101 }
 0x2be   :  { %970 = vsyncpa [#allocation4], 1 }
 0x2bf   :  { %972 = vsyncpa [#allocation4 + $0x1], 1 }

</bundles_post_ra>
